<compile_context>
chip_gen: v5e
topology: v5e:2x2
jax: 0.10.0
libtpu: 0.0.40
codegen_flags: <defaults>
</compile_context>

<pallas_src>
import jax
import jax.numpy as jnp
from jax.experimental import pallas as pl
from jax.experimental.pallas import tpu as pltpu

BN_EPS = 1e-5


def _round_up(n: int, m: int) -> int:
    return ((n + m - 1) // m) * m


def ann_kernel(x_ref,
               w1_ref, b1_ref, a1_ref,
               w2_ref, b2_ref, a2_ref,
               w3_ref,
               o_ref):
    # x_ref: (C=12, B_tile) — batch on lanes (bf16 or f32).
    x = x_ref[...]

    # ---- layer 1: folded Linear+BN (6,12)@(12,Bt), f32 accumulate + PReLU ----
    h = jnp.dot(w1_ref[...], x, preferred_element_type=jnp.float32) + b1_ref[...]
    a1 = a1_ref[0, 0]
    h = jnp.where(h >= 0.0, h, a1 * h)

    # ---- layer 2: folded Linear+BN (3,6)@(6,Bt) + bias (3,1) + PReLU ----
    h = jnp.dot(w2_ref[...], h, preferred_element_type=jnp.float32) + b2_ref[...]
    a2 = a2_ref[0, 0]
    h = jnp.where(h >= 0.0, h, a2 * h)

    # ---- layer 3: Linear (1,3)@(3,Bt), no bias -> (1, Bt) lane-dense ----
    o_ref[...] = jnp.dot(w3_ref[...], h, preferred_element_type=jnp.float32)


def ann_forward(x, params, image_size=5, b_tile=131072, act_dtype=jnp.bfloat16):
    """x: (B, C, H, W) float32 NCHW (or precomputed (B, C) center pixels).
    Returns (B, num_output_classes) float32."""
    c = image_size // 2

    # Single-pass extraction: transpose-then-slice lets XLA emit one strided
    # gather that writes (C, B) directly; the pad + dtype cast below fuse in.
    if x.ndim == 4:
        xt = jnp.transpose(x, (1, 0, 2, 3))[:, :, c, c]          # (C, B)
    else:
        xt = x.T                                                 # (C, B)
    C, B = xt.shape

    # ---- Fold BatchNorm (eval mode) into the preceding Linear weights ----
    s1 = params["g1"] * jax.lax.rsqrt(params["rv1"] + BN_EPS)        # (1, c1)
    w1t = (params["w1"] * s1).T.astype(act_dtype)                    # (c1, C)
    b1t = ((params["b1"] - params["rm1"]) * s1 + params["be1"]).T    # (c1, 1)

    s2 = params["g2"] * jax.lax.rsqrt(params["rv2"] + BN_EPS)        # (1, c2)
    w2t = (params["w2"] * s2).T                                      # (c2, c1)
    b2t = ((params["b2"] - params["rm2"]) * s2 + params["be2"]).T    # (c2, 1)

    w3t = params["w3"].T                                             # (n_out, c2)
    n_out = w3t.shape[0]

    # ---- Batch-tile selection ------------------------------------------------
    # Big tiles amortize the ~0.35 us/step grid overhead; keep >= 2 (even) grid
    # steps when the batch allows so v7x's two TensorCores both get work and
    # double-buffering can overlap DMA with compute. Tiles are ceil(B/steps)
    # rounded to 128 lanes, bounding padding waste.
    steps = max(1, pl.cdiv(B, b_tile))
    if B > 128:
        steps = max(steps, 2)
    if steps > 1 and steps % 2:
        steps += 1
    bt = _round_up(pl.cdiv(B, steps), 128)
    Bp = _round_up(B, bt)

    if Bp != B:
        xt = jnp.pad(xt, ((0, 0), (0, Bp - B)))
    xt = xt.astype(act_dtype)

    grid = (Bp // bt,)
    smem = pltpu.MemorySpace.SMEM

    def resident(shape):
        # Whole small param tensor, same block every grid step -> stays in VMEM.
        return pl.BlockSpec(shape, lambda i: (0, 0))

    out = pl.pallas_call(
        ann_kernel,
        out_shape=jax.ShapeDtypeStruct((n_out, Bp), jnp.float32),
        grid=grid,
        in_specs=[
            pl.BlockSpec((C, bt), lambda i: (0, i)),       # activations (pipelined)
            resident(w1t.shape), resident(b1t.shape),
            pl.BlockSpec(memory_space=smem),               # PReLU a1 scalar
            resident(w2t.shape), resident(b2t.shape),
            pl.BlockSpec(memory_space=smem),               # PReLU a2 scalar
            resident(w3t.shape),
        ],
        out_specs=pl.BlockSpec((n_out, bt), lambda i: (0, i)),
        compiler_params=pltpu.CompilerParams(
            dimension_semantics=("parallel",)),
    )(xt, w1t, b1t, params["a1"], w2t, b2t, params["a2"], w3t)

    # Drop batch padding, return (B, n_out) to match the PyTorch module.
    return out[:, :B].T


def init_params(key, num_input_channels=12, num_output_classes=1):
    """Deterministic init mirroring PyTorch defaults (Linear: U(-1/sqrt(fan_in), ..),
    BatchNorm: gamma=1, beta=0, running_mean=0, running_var=1, PReLU a=0.25)."""
    c0 = num_input_channels
    c1 = num_input_channels // 2
    c2 = num_input_channels // 4

    k1, k2, k3, k4, k5 = jax.random.split(key, 5)

    def lin(kw, kb, fan_in, fan_out, bias=True):
        bound = 1.0 / jnp.sqrt(float(fan_in))
        w = jax.random.uniform(kw, (fan_in, fan_out), jnp.float32, -bound, bound)
        b = (jax.random.uniform(kb, (1, fan_out), jnp.float32, -bound, bound)
             if bias else None)
        return w, b

    w1, b1 = lin(k1, k2, c0, c1)
    w2, b2 = lin(k3, k4, c1, c2)
    w3, _ = lin(k5, k5, c2, num_output_classes, bias=False)

    def bn(n):
        return (jnp.ones((1, n), jnp.float32),   # gamma
                jnp.zeros((1, n), jnp.float32),  # beta
                jnp.zeros((1, n), jnp.float32),  # running mean
                jnp.ones((1, n), jnp.float32))   # running var

    g1, be1, rm1, rv1 = bn(c1)
    g2, be2, rm2, rv2 = bn(c2)

    return dict(
        w1=w1, b1=b1, g1=g1, be1=be1, rm1=rm1, rv1=rv1,
        a1=jnp.full((1, 1), 0.25, jnp.float32),
        w2=w2, b2=b2, g2=g2, be2=be2, rm2=rm2, rv2=rv2,
        a2=jnp.full((1, 1), 0.25, jnp.float32),
        w3=w3,
    )


def ann_reference(x, params, image_size=5):
    """Pure-JAX reference of the same forward pass (unfused BN, for validation)."""
    h = x[:, :, image_size // 2, image_size // 2]
    h = h @ params["w1"] + params["b1"]
    h = (h - params["rm1"]) * jax.lax.rsqrt(params["rv1"] + BN_EPS) * params["g1"] + params["be1"]
    h = jnp.where(h >= 0, h, params["a1"][0, 0] * h)
    h = h @ params["w2"] + params["b2"]
    h = (h - params["rm2"]) * jax.lax.rsqrt(params["rv2"] + BN_EPS) * params["g2"] + params["be2"]
    h = jnp.where(h >= 0, h, params["a2"][0, 0] * h)
    return h @ params["w3"]


if __name__ == "__main__":
    key = jax.random.PRNGKey(0)
    kx, kx2, kp = jax.random.split(key, 3)

    C, IMG = 12, 5
    params = init_params(kp, num_input_channels=C, num_output_classes=1)

    # Test 1: tiny batch, f32 activation path (exact), single grid step.
    B1 = 8
    x1 = jax.random.normal(kx, (B1, C, IMG, IMG), dtype=jnp.float32)
    out1 = jax.block_until_ready(
        ann_forward(x1, params, image_size=IMG, act_dtype=jnp.float32))
    ref1 = ann_reference(x1, params, image_size=IMG)
    assert out1.shape == (B1, 1)
    assert jnp.allclose(out1, ref1, atol=1e-4, rtol=1e-4), "mismatch vs reference (B=8, f32)"

    # Test 2: non-multiple-of-128 batch with a small tile -> multi-step grid,
    # padding, pipelining; still f32 so the tolerance stays tight.
    B2 = 1000
    x2 = jax.random.normal(kx2, (B2, C, IMG, IMG), dtype=jnp.float32)
    out2 = jax.block_until_ready(
        ann_forward(x2, params, image_size=IMG, b_tile=256, act_dtype=jnp.float32))
    ref2 = ann_reference(x2, params, image_size=IMG)
    assert out2.shape == (B2, 1)
    assert jnp.allclose(out2, ref2, atol=1e-4, rtol=1e-4), "mismatch vs reference (B=1000, f32)"

    # Test 3: default config — bf16 activations, auto-sized tiles (grid kept >= 2).
    # Looser tolerance is the intentional bf16 precision trade, not a kernel bug.
    out3 = jax.block_until_ready(ann_forward(x2, params, image_size=IMG))
    assert out3.shape == (B2, 1)
    assert jnp.allclose(out3, ref2, atol=3e-2, rtol=3e-2), "mismatch vs reference (B=1000, bf16)"

    print("KERNEL_OK")
</pallas_src>

<mosaic_0001>
module attributes {stable_mosaic.version = 11 : i64} {
  func.func @ann_kernel(%arg0: i32, %arg1: memref<12x128xf32, #tpu.memory_space<vmem>>, %arg2: memref<6x12xf32, #tpu.memory_space<vmem>>, %arg3: memref<6x1xf32, #tpu.memory_space<vmem>>, %arg4: memref<1x1xf32, #tpu.memory_space<smem>>, %arg5: memref<3x6xf32, #tpu.memory_space<vmem>>, %arg6: memref<3x1xf32, #tpu.memory_space<vmem>>, %arg7: memref<1x1xf32, #tpu.memory_space<smem>>, %arg8: memref<1x3xf32, #tpu.memory_space<vmem>>, %arg9: memref<1x128xf32, #tpu.memory_space<vmem>>) attributes {dimension_semantics = [#tpu.dimension_semantics<parallel>], iteration_bounds = array<i64: 1>, scalar_prefetch = 0 : i64, scratch_operands = 0 : i64, tpu.core_type = #tpu.core_type<tc>, window_params = [{transform_indices = @transform_0, window_bounds = array<i64: 12, 128>}, {pipeline_mode = #tpu.pipeline_mode<synchronous>, transform_indices = @transform_1, window_bounds = array<i64: 6, 12>}, {pipeline_mode = #tpu.pipeline_mode<synchronous>, transform_indices = @transform_2, window_bounds = array<i64: 6, 1>}, {transform_indices = @transform_3, window_bounds = array<i64: 1, 1>}, {pipeline_mode = #tpu.pipeline_mode<synchronous>, transform_indices = @transform_4, window_bounds = array<i64: 3, 6>}, {pipeline_mode = #tpu.pipeline_mode<synchronous>, transform_indices = @transform_5, window_bounds = array<i64: 3, 1>}, {transform_indices = @transform_6, window_bounds = array<i64: 1, 1>}, {pipeline_mode = #tpu.pipeline_mode<synchronous>, transform_indices = @transform_7, window_bounds = array<i64: 1, 3>}, {transform_indices = @transform_8, window_bounds = array<i64: 1, 128>}]} {
    %c0 = arith.constant 0 : index
    %c0_0 = arith.constant 0 : index
    %0 = vector.load %arg1[%c0, %c0_0] : memref<12x128xf32, #tpu.memory_space<vmem>>, vector<12x128xf32>
    %c0_1 = arith.constant 0 : index
    %c0_2 = arith.constant 0 : index
    %1 = vector.load %arg2[%c0_1, %c0_2] : memref<6x12xf32, #tpu.memory_space<vmem>>, vector<6x12xf32>
    %cst = arith.constant dense<0.000000e+00> : vector<6x128xf32>
    %2 = tpu.matmul %1, %0, %cst {dimension_numbers = #tpu.dot_dimension_numbers<[1], [0], [0], [1], [0, 0, 1, 1], [], []>} : vector<6x12xf32>, vector<12x128xf32>, vector<6x128xf32> -> vector<6x128xf32>
    %c0_3 = arith.constant 0 : index
    %c0_4 = arith.constant 0 : index
    %3 = vector.load %arg3[%c0_3, %c0_4] : memref<6x1xf32, #tpu.memory_space<vmem>>, vector<6x1xf32>
    %4 = vector.broadcast %3 : vector<6x1xf32> to vector<6x128xf32>
    %5 = arith.addf %2, %4 : vector<6x128xf32>
    %c0_5 = arith.constant 0 : index
    %c0_6 = arith.constant 0 : index
    %6 = memref.load %arg4[%c0_5, %c0_6] : memref<1x1xf32, #tpu.memory_space<smem>>
    %cst_7 = arith.constant 0.000000e+00 : f32
    %7 = vector.broadcast %cst_7 : f32 to vector<6x128xf32>
    %8 = arith.cmpf oge, %5, %7 : vector<6x128xf32>
    %9 = vector.broadcast %6 : f32 to vector<6x128xf32>
    %10 = arith.mulf %9, %5 : vector<6x128xf32>
    %11 = arith.select %8, %5, %10 : vector<6x128xi1>, vector<6x128xf32>
    %c0_8 = arith.constant 0 : index
    %c0_9 = arith.constant 0 : index
    %12 = vector.load %arg5[%c0_8, %c0_9] : memref<3x6xf32, #tpu.memory_space<vmem>>, vector<3x6xf32>
    %cst_10 = arith.constant dense<0.000000e+00> : vector<3x128xf32>
    %13 = tpu.matmul %12, %11, %cst_10 {dimension_numbers = #tpu.dot_dimension_numbers<[1], [0], [0], [1], [0, 0, 1, 1], [], []>} : vector<3x6xf32>, vector<6x128xf32>, vector<3x128xf32> -> vector<3x128xf32>
    %c0_11 = arith.constant 0 : index
    %c0_12 = arith.constant 0 : index
    %14 = vector.load %arg6[%c0_11, %c0_12] : memref<3x1xf32, #tpu.memory_space<vmem>>, vector<3x1xf32>
    %15 = vector.broadcast %14 : vector<3x1xf32> to vector<3x128xf32>
    %16 = arith.addf %13, %15 : vector<3x128xf32>
    %c0_13 = arith.constant 0 : index
    %c0_14 = arith.constant 0 : index
    %17 = memref.load %arg7[%c0_13, %c0_14] : memref<1x1xf32, #tpu.memory_space<smem>>
    %cst_15 = arith.constant 0.000000e+00 : f32
    %18 = vector.broadcast %cst_15 : f32 to vector<3x128xf32>
    %19 = arith.cmpf oge, %16, %18 : vector<3x128xf32>
    %20 = vector.broadcast %17 : f32 to vector<3x128xf32>
    %21 = arith.mulf %20, %16 : vector<3x128xf32>
    %22 = arith.select %19, %16, %21 : vector<3x128xi1>, vector<3x128xf32>
    %c0_16 = arith.constant 0 : index
    %c0_17 = arith.constant 0 : index
    %23 = vector.load %arg8[%c0_16, %c0_17] : memref<1x3xf32, #tpu.memory_space<vmem>>, vector<1x3xf32>
    %cst_18 = arith.constant dense<0.000000e+00> : vector<1x128xf32>
    %24 = tpu.matmul %23, %22, %cst_18 {dimension_numbers = #tpu.dot_dimension_numbers<[1], [0], [0], [1], [0, 0, 1, 1], [], []>} : vector<1x3xf32>, vector<3x128xf32>, vector<1x128xf32> -> vector<1x128xf32>
    %c0_19 = arith.constant 0 : index
    %c0_20 = arith.constant 0 : index
    %25 = vector.load %arg9[%c0_19, %c0_20] : memref<1x128xf32, #tpu.memory_space<vmem>>, vector<1x128xf32>
    tpu.vector_store %arg9[%c0_19, %c0_20], %24 {strides = array<i32>} : memref<1x128xf32, #tpu.memory_space<vmem>>, vector<1x128xf32>,
    return
  }
  func.func @transform_0(%arg0: i32) -> (i32, i32) {
    %c0_i32 = arith.constant 0 : i32
    %c0_i32_0 = arith.constant 0 : i32
    return %c0_i32, %arg0 : i32, i32
  }
  func.func @transform_1(%arg0: i32) -> (i32, i32) {
    %c0_i32 = arith.constant 0 : i32
    %c0_i32_0 = arith.constant 0 : i32
    %c0_i32_1 = arith.constant 0 : i32
    return %c0_i32, %c0_i32_0 : i32, i32
  }
  func.func @transform_2(%arg0: i32) -> (i32, i32) {
    %c0_i32 = arith.constant 0 : i32
    %c0_i32_0 = arith.constant 0 : i32
    %c0_i32_1 = arith.constant 0 : i32
    return %c0_i32, %c0_i32_0 : i32, i32
  }
  func.func @transform_3(%arg0: i32) -> (i32, i32) {
    %c0_i32 = arith.constant 0 : i32
    %c0_i32_0 = arith.constant 0 : i32
    %c0_i32_1 = arith.constant 0 : i32
    return %c0_i32, %c0_i32_0 : i32, i32
  }
  func.func @transform_4(%arg0: i32) -> (i32, i32) {
    %c0_i32 = arith.constant 0 : i32
    %c0_i32_0 = arith.constant 0 : i32
    %c0_i32_1 = arith.constant 0 : i32
    return %c0_i32, %c0_i32_0 : i32, i32
  }
  func.func @transform_5(%arg0: i32) -> (i32, i32) {
    %c0_i32 = arith.constant 0 : i32
    %c0_i32_0 = arith.constant 0 : i32
    %c0_i32_1 = arith.constant 0 : i32
    return %c0_i32, %c0_i32_0 : i32, i32
  }
  func.func @transform_6(%arg0: i32) -> (i32, i32) {
    %c0_i32 = arith.constant 0 : i32
    %c0_i32_0 = arith.constant 0 : i32
    %c0_i32_1 = arith.constant 0 : i32
    return %c0_i32, %c0_i32_0 : i32, i32
  }
  func.func @transform_7(%arg0: i32) -> (i32, i32) {
    %c0_i32 = arith.constant 0 : i32
    %c0_i32_0 = arith.constant 0 : i32
    %c0_i32_1 = arith.constant 0 : i32
    return %c0_i32, %c0_i32_0 : i32, i32
  }
  func.func @transform_8(%arg0: i32) -> (i32, i32) {
    %c0_i32 = arith.constant 0 : i32
    %c0_i32_0 = arith.constant 0 : i32
    return %c0_i32, %arg0 : i32, i32
  }
}

</mosaic_0001>

<bundles_post_ra>
// kernel: tpu_custom_call.1
= control target key start
LH: loop header
LB: loop body
LE: loop exit
PB: predicated region body
PF: predicated region fallthrough
CT: control target
= control target key end

     0   :  { %15 = vsyncpa [#allocation5], 0  ;;  %s318_s0 = inlined_call_operand.hbm [shape: f32[12,128], index: 0, kind: input, shape index: {}]   ;;  %s319_s1 = inlined_call_operand.vmem [shape: f32[6,12], index: 1, kind: input, shape index: {}]   ;;  %s320_s2 = inlined_call_operand.vmem [shape: f32[6,1], index: 2, kind: input, shape index: {}]   ;;  %s321_s3 = inlined_call_operand.<no memory space> [shape: f32[1,1], index: 3, kind: input, shape index: {}]   ;;  %s322_s4 = inlined_call_operand.vmem [shape: f32[3,6], index: 4, kind: input, shape index: {}]   ;;  %s323_s5 = inlined_call_operand.vmem [shape: f32[3,1], index: 5, kind: input, shape index: {}]   ;;  %s324_s6 = inlined_call_operand.<no memory space> [shape: f32[1,1], index: 6, kind: input, shape index: {}]   ;;  %s325_s7 = inlined_call_operand.vmem [shape: f32[1,3], index: 7, kind: input, shape index: {}]   ;;  %s326_s8 = inlined_call_operand.hbm [shape: f32[1,128], index: 8, kind: output, shape index: {}]  }
   0x1   :  { %16 = vsyncpa [#allocation6], 0  ;;  %s21_s29 = sshll.u32 %s318_s0, 4  ;;  %s241_s30 = smov [#allocation4]   ;;  %s22_s29 = int_to_ptr.hbm [resolvable:$true] %s21_s29 }
   0x2   :  { %s23_s9 = sshll.u32 %s241_s30, 4  ;;  %s242_s10 = smov 128   ;;  %s24_s9 = int_to_ptr.vmem [resolvable:$true] %s23_s9 }
   0x3   :  { %s243_s11 = smov 8  }
   0x4   :  { %29 = dma.hbm_to_vmem [thread:$0]  %s22_s29, 256, %s24_s9, [#allocation5], %s242_s10, %s242_s10, %s243_s11  }
   0x5   :  { %237 = dma.done.wait [#allocation5], 256  }
   0x6   :  { %238 = vsyncadd [#allocation5], 4294967040  ;;  %v244_v0 = vmov 0   ;;  %vm61_vm0 = vcmask 1043456   ;;  %v49_v1 = vld [vmem:[#allocation4 + $0x8] sm:$0xf]  ;;  %v87_v8 = vstv %s321_s3  ;;  %v127_v15 = vstv %s324_s6 }
   0x7   :  { %188 = vset.pattern.permute.xlu0 %v244_v0  ;;  %v48_v2 = vld [vmem:[#allocation4] sm:$0xff]  ;;  %177 = vmatpush.msk.msra.mxu0 %vm61_vm0, %v49_v1  ;;  %vm57_vm1 = vcmask 97280   ;;  %vm101_vm3 = vcmask 1045504   ;;  %vm97_vm4 = vcmask 48128   ;;  %vm135_vm6 = vcmask 1042432   ;;  %s167_s24 = sshll.u32 %s326_s8, 4  ;;  %s168_s24 = int_to_ptr.hbm [resolvable:$true] %s167_s24 }
   0x8   :  { %v50_v3 = vld [vmem:[%s319_s1] sm:$0x3f]  ;;  %vm131_vm7 = vcmask 23552  }
   0x9   :  { %v51_v4 = vld [vmem:[%s320_s2] sm:$0x3f]  ;;  %80 = vmatpush.msra.mxu0 %v48_v2 }
   0xa   :  { %54 = vperm.xlu0 %188, %v51_v4   ;;  %178 = vmatmul.msk.f32.vlgmr.msra.gmra.mxu0 %vm57_vm1, %v50_v3  ;;  %v91_v5 = vld [vmem:[%s323_s5] sm:$0x7] }
   0xb   :  { %v90_v11 = vld [vmem:[%s322_s4] sm:$0x7]  ;;  %s245_s4 = smov [#allocation7]  }
   0xc   :  { %v130_v18 = vld [vmem:[%s325_s7] sm:$0x1]  ;;  %s165_s21 = sshll.u32 %s245_s4, 4  ;;  %s166_s21 = int_to_ptr.vmem [resolvable:$true] %s165_s21 }
  0x12   :  { %94 = vperm.xlu0 %188, %v91_v5  }
  0x7c   :  { %v55_v6 = vpop.permute.xlu0 %54 }
  0x84   :  { %v95_v13 = vpop.permute.xlu0 %94 }
  0x87   :  { %v82_v7 = vpop.f32.mrf.mxu0 }
  0x88   :  { %v83_v9 = vadd.f32 %v82_v7, %v55_v6 }
  0x8a   :  { %vm86_vm2 = vcmp.ge.f32.partialorder %v83_v9, 0.0  ;;  %v88_v10 = vmul.f32 %v87_v8, %v83_v9 }
  0x8c   :  { %v89_v12 = vsel %vm86_vm2, %v83_v9, %v88_v10 }
  0x8d   :  { %179 = vmatpush.msk.msra.mxu1 %vm101_vm3, %v89_v12 }
  0x8e   :  { %180 = vmatmul.msk.f32.vlgmr.msra.gmra.mxu1 %vm97_vm4, %v90_v11 }
 0x10b   :  { %v122_v14 = vpop.f32.mrf.mxu1 }
 0x10c   :  { %v123_v16 = vadd.f32 %v122_v14, %v95_v13 }
 0x10e   :  { %vm126_vm5 = vcmp.ge.f32.partialorder %v123_v16, 0.0  ;;  %v128_v17 = vmul.f32 %v127_v15, %v123_v16 }
 0x110   :  { %v129_v19 = vsel %vm126_vm5, %v123_v16, %v128_v17 }
 0x111   :  { %181 = vmatpush.msk.msra.mxu2 %vm135_vm6, %v129_v19 }
 0x112   :  { %182 = vmatmul.msk.f32.vlgmr.msra.gmra.mxu2 %vm131_vm7, %v130_v18 }
 0x195   :  { %v156_v20 = vpop.f32.mrf.mxu2 }
 0x196   :  { %159 = vst [vmem:[#allocation7] sm:$0x1] %v156_v20 }
 0x197   :  { %170 = dma.vmem_to_hbm [thread:$0]  %s166_s21, 16, %s168_s24, [#allocation6]  }
 0x198   :  { %239 = dma.done.wait [#allocation6], 16  }
 0x199   :  { %240 = vsyncadd [#allocation6], 4294967280 }
 0x19a   :  { %175 = vsyncpa [#allocation5], 1 }
 0x19b   :  { %176 = vsyncpa [#allocation6], 1 }

</bundles_post_ra>
